<compile_context>
chip_gen: v5e
topology: v5e:2x2
jax: 0.10.0
libtpu: 0.0.40
codegen_flags: <defaults>
</compile_context>

<pallas_src>
import functools

import jax
import jax.numpy as jnp
import numpy as np
from jax import lax
from jax.experimental import pallas as pl
from jax.experimental.pallas import tpu as pltpu

EPS = 1e-5
_VMEM_LIMIT = 32 * 1024 * 1024


# --------------------------------------------------------------------------
# Trace-time weight preprocessing (tiny arrays, built once per call by XLA)
# --------------------------------------------------------------------------
def _build_row_weights(w_t, W):
    """Torch (Cout, Cin, 3, 3) -> (3, W*Cin, W*Cout) row-Toeplitz matrices.

    For a stride-1, pad-1 conv:  y[h, w*Cout + o] = sum_ki  xrow_{h-1+ki} @ M[ki]
    where xrow_{-1} / xrow_{H} are zero rows.  Width zero-padding is folded
    into the Toeplitz structure (columns outside [0, W) are simply dropped).
    """
    Cout, Cin, KH, KW = w_t.shape
    wi = jnp.arange(W)[:, None]                       # input column
    wo = jnp.arange(W)[None, :]                       # output column
    kj = wi - wo + 1                                  # tap index for (wi, wo)
    valid = ((kj >= 0) & (kj < KW)).astype(w_t.dtype)
    kjc = jnp.clip(kj, 0, KW - 1)
    wt = jnp.transpose(w_t, (2, 3, 1, 0))             # (KH, KW, Cin, Cout)
    mats = []
    for ki in range(KH):
        blk = wt[ki][kjc] * valid[..., None, None]    # (W, W, Cin, Cout)
        mats.append(jnp.transpose(blk, (0, 2, 1, 3)).reshape(W * Cin, W * Cout))
    return jnp.stack(mats)                            # (3, W*Cin, W*Cout)


def _build_deform_weights(w_t, W):
    """Torch (Cout, Cin, 3, 3) -> (9, W*Cin, Cout); tap k weight tiled over W."""
    mats = []
    for k in range(9):
        ki, kj = k // 3, k % 3
        wk = jnp.transpose(w_t[:, :, ki, kj])         # (Cin, Cout)
        mats.append(jnp.tile(wk, (W, 1)))             # (W*Cin, Cout)
    return jnp.stack(mats)


def _build_base_coords(Ho, Wo, stride):
    """(Ho*Wo, 2) float32: per output pixel [ho*stride - 1, wo*stride - 1]."""
    by = jnp.repeat(jnp.arange(Ho, dtype=jnp.float32) * stride - 1.0, Wo)
    bx = jnp.tile(jnp.arange(Wo, dtype=jnp.float32) * stride - 1.0, Ho)
    return jnp.stack([by, bx], axis=-1)


# --------------------------------------------------------------------------
# Kernel 1: offset conv (18) + conv1 (planes), shared padded-x scratch.
# --------------------------------------------------------------------------
def _layer1_kernel(x_ref, woff_ref, w1_ref, boff_ref, b1_ref,
                   off_ref, x1_ref, xp_ref):
    H = x_ref.shape[1]
    xp_ref[...] = jnp.zeros_like(xp_ref)              # zero height-pad rows
    xp_ref[1:1 + H, :] = x_ref[0]
    off = boff_ref[...]                               # (1, W*18)  (bias row)
    x1 = b1_ref[...]                                  # (1, W*planes)
    for ki in range(3):
        a = xp_ref[ki:ki + H, :]                      # (H, W*Cin)
        off = off + jnp.dot(a, woff_ref[ki], preferred_element_type=jnp.float32)
        x1 = x1 + jnp.dot(a, w1_ref[ki], preferred_element_type=jnp.float32)
    off_ref[0] = off                                  # (H, W*18)  lane-dense
    x1_ref[0] = x1                                    # (H, W*planes)


def _layer1_call(x2d, woff_rows, w1_rows, boff_row, b1_row, H, W, Cin, planes):
    Nb = x2d.shape[0]
    WC = W * Cin
    return pl.pallas_call(
        _layer1_kernel,
        out_shape=(jax.ShapeDtypeStruct((Nb, H, W * 18), jnp.float32),
                   jax.ShapeDtypeStruct((Nb, H, W * planes), jnp.float32)),
        grid=(Nb,),
        in_specs=[
            pl.BlockSpec((1, H, WC), lambda n: (n, 0, 0)),
            pl.BlockSpec((3, WC, W * 18), lambda n: (0, 0, 0)),
            pl.BlockSpec((3, WC, W * planes), lambda n: (0, 0, 0)),
            pl.BlockSpec((1, W * 18), lambda n: (0, 0)),
            pl.BlockSpec((1, W * planes), lambda n: (0, 0)),
        ],
        out_specs=(pl.BlockSpec((1, H, W * 18), lambda n: (n, 0, 0)),
                   pl.BlockSpec((1, H, W * planes), lambda n: (n, 0, 0))),
        scratch_shapes=[pltpu.VMEM((H + 2, WC), jnp.float32)],
        compiler_params=pltpu.CompilerParams(
            dimension_semantics=("parallel",), vmem_limit_bytes=_VMEM_LIMIT),
    )(x2d, woff_rows, w1_rows, boff_row, b1_row)


# --------------------------------------------------------------------------
# Kernel 2: deformable conv (torchvision DeformConv2d, 3x3, pad 1, 1 group)
# Separable row/col one-hot sampling, per-tap accumulation into (P, Cout).
# The 0.5 of the final average is folded into the weights; bias is folded
# into the tail kernel's shift.
# --------------------------------------------------------------------------
def _deform_kernel(x_ref, off_ref, w_ref, base_ref, lanex_ref, o_ref):
    H = x_ref.shape[1]
    WC = x_ref.shape[2]
    Cout = o_ref.shape[2]
    P = off_ref.shape[1]

    X = x_ref[0]                                      # (H, W*Cin)
    off = off_ref[0]                                  # (P, 18)
    base = base_ref[...]                              # (P, 2)
    lanex = lanex_ref[...]                            # (1, W*Cin) int32 (= x index)
    by = base[:, 0:1]
    bx = base[:, 1:2]
    h_iota = lax.broadcasted_iota(jnp.int32, (P, H), 1)

    acc = jnp.zeros((P, Cout), jnp.float32)
    for k in range(9):
        ki, kj = k // 3, k % 3
        py = by + ki + off[:, 2 * k:2 * k + 1]        # h-offset first (torchvision)
        px = bx + kj + off[:, 2 * k + 1:2 * k + 2]
        y0 = jnp.floor(py)
        x0 = jnp.floor(px)
        fy = py - y0
        fx = px - x0
        y0i = y0.astype(jnp.int32)
        x0i = x0.astype(jnp.int32)
        # Row one-hot (P, H): OOB rows never match -> zero contribution.
        r_oh = (jnp.where(h_iota == y0i, 1.0 - fy, 0.0)
                + jnp.where(h_iota == y0i + 1, fy, 0.0))
        rows = jnp.dot(r_oh, X, preferred_element_type=jnp.float32)   # (P, W*Cin)
        # Column one-hot expanded over the interleaved (x, c) lane layout.
        c_oh = (jnp.where(lanex == x0i, 1.0 - fx, 0.0)
                + jnp.where(lanex == x0i + 1, fx, 0.0))
        acc = acc + jnp.dot(rows * c_oh, w_ref[k],
                            preferred_element_type=jnp.float32)
    o_ref[0] = acc


def _pick_tho(Ho, Wo, H, WC, Cout, budget_bytes=6 << 20):
    """VMEM-budget driven output-row tile (keeps v7x's 64 MiB VMEM safe)."""
    per_row = Wo * (H + 3 * WC + Cout + 24) * 4
    cap = max(1, budget_bytes // max(per_row, 1))
    if cap >= Ho:
        return Ho
    for t in range(int(min(cap, Ho - 1)), 0, -1):
        if Ho % t == 0 and (t * Wo) % 8 == 0:
            return t
    return Ho                                         # full image always layout-legal


def _deform_call(x2d, off, wtile, base, lanex, H, W, Cin, Ho, Wo, Cout):
    Nb = x2d.shape[0]
    WC = W * Cin
    tho = _pick_tho(Ho, Wo, H, WC, Cout)
    P = tho * Wo
    return pl.pallas_call(
        _deform_kernel,
        out_shape=jax.ShapeDtypeStruct((Nb, Ho * Wo, Cout), jnp.float32),
        grid=(Nb, Ho // tho),
        in_specs=[
            pl.BlockSpec((1, H, WC), lambda n, t: (n, 0, 0)),
            pl.BlockSpec((1, P, 18), lambda n, t: (n, t, 0)),
            pl.BlockSpec((9, WC, Cout), lambda n, t: (0, 0, 0)),
            pl.BlockSpec((P, 2), lambda n, t: (t, 0)),
            pl.BlockSpec((1, WC), lambda n, t: (0, 0)),
        ],
        out_specs=pl.BlockSpec((1, P, Cout), lambda n, t: (n, t, 0)),
        compiler_params=pltpu.CompilerParams(
            dimension_semantics=("parallel", "parallel"),
            vmem_limit_bytes=_VMEM_LIMIT),
    )(x2d, off, wtile, base, lanex)


# --------------------------------------------------------------------------
# Kernel 3: conv2 + bn2 + relu + conv3 + bn3 + (dconv + x3)/2, fully fused.
# x2 lives only in VMEM.
# --------------------------------------------------------------------------
def _tail_kernel(x1_ref, d_ref, w2_ref, w3_ref, s2_ref, t2_ref, s3_ref, t3_ref,
                 o_ref, xp2_ref, xp3_ref):
    Ho = x1_ref.shape[1]

    xp2_ref[...] = jnp.zeros_like(xp2_ref)
    xp2_ref[1:1 + Ho, :] = x1_ref[0]
    acc2 = None
    for ki in range(3):
        d = jnp.dot(xp2_ref[ki:ki + Ho, :], w2_ref[ki],
                    preferred_element_type=jnp.float32)
        acc2 = d if acc2 is None else acc2 + d
    x2 = jnp.maximum(acc2 * s2_ref[...] + t2_ref[...], 0.0)

    xp3_ref[...] = jnp.zeros_like(xp3_ref)
    xp3_ref[1:1 + Ho, :] = x2
    acc3 = None
    for ki in range(3):
        d = jnp.dot(xp3_ref[ki:ki + Ho, :], w3_ref[ki],
                    preferred_element_type=jnp.float32)
        acc3 = d if acc3 is None else acc3 + d
    # s3/t3 already contain the 0.5 average and the deform bias; d_ref is 0.5*dconv.
    o_ref[0] = acc3 * s3_ref[...] + t3_ref[...] + d_ref[0]


def _tail_call(x1, dconv, w2_rows, w3_rows, s2, t2, s3, t3, Ho, Wo, planes, cout):
    Nb = x1.shape[0]
    WP = Wo * planes
    WCt = Wo * cout
    return pl.pallas_call(
        _tail_kernel,
        out_shape=jax.ShapeDtypeStruct((Nb, Ho, WCt), jnp.float32),
        grid=(Nb,),
        in_specs=[
            pl.BlockSpec((1, Ho, WP), lambda n: (n, 0, 0)),
            pl.BlockSpec((1, Ho, WCt), lambda n: (n, 0, 0)),
            pl.BlockSpec((3, WP, WP), lambda n: (0, 0, 0)),
            pl.BlockSpec((3, WP, WCt), lambda n: (0, 0, 0)),
            pl.BlockSpec((1, WP), lambda n: (0, 0)),
            pl.BlockSpec((1, WP), lambda n: (0, 0)),
            pl.BlockSpec((1, WCt), lambda n: (0, 0)),
            pl.BlockSpec((1, WCt), lambda n: (0, 0)),
        ],
        out_specs=pl.BlockSpec((1, Ho, WCt), lambda n: (n, 0, 0)),
        scratch_shapes=[pltpu.VMEM((Ho + 2, WP), jnp.float32),
                        pltpu.VMEM((Ho + 2, WP), jnp.float32)],
        compiler_params=pltpu.CompilerParams(
            dimension_semantics=("parallel",), vmem_limit_bytes=_VMEM_LIMIT),
    )(x1, dconv, w2_rows, w3_rows, s2, t2, s3, t3)


# --------------------------------------------------------------------------
# Def_Block forward (Pallas)
# --------------------------------------------------------------------------
def def_block_pallas(x_nchw, p, stride):
    Nb, Cin, H, W = x_nchw.shape
    planes = p["w1"].shape[0]
    cout = p["w3"].shape[0]

    x2d = jnp.transpose(x_nchw, (0, 2, 3, 1)).reshape(Nb, H, W * Cin)  # NHWC rows

    # BN (+ conv bias) folded into per-channel scale / shift.
    scale2 = p["g2"] / jnp.sqrt(p["v2"] + EPS)
    shift2 = p["bt2"] + (p["b2"] - p["m2"]) * scale2
    scale3 = p["g3"] / jnp.sqrt(p["v3"] + EPS)
    shift3 = p["bt3"] + (p["b3"] - p["m3"]) * scale3

    # ---- layer 1: offset conv + conv1, one kernel, in-kernel im2col.
    woff_rows = _build_row_weights(p["w_off"], W)
    w1_rows = _build_row_weights(p["w1"], W)
    boff_row = jnp.tile(p["b_off"], W).reshape(1, W * 18)
    b1_row = jnp.tile(p["b1"], W).reshape(1, W * planes)
    off_full, x1_full = _layer1_call(x2d, woff_rows, w1_rows, boff_row, b1_row,
                                     H, W, Cin, planes)

    if stride == 1:
        Ho, Wo = H, W
        off = off_full.reshape(Nb, Ho * Wo, 18)        # free view
        x1 = x1_full                                   # (Nb, Ho, Wo*planes)
    else:
        Ho = (H - 1) // stride + 1
        Wo = (W - 1) // stride + 1
        off = off_full.reshape(Nb, H, W, 18)[:, ::stride, ::stride, :]
        off = off.reshape(Nb, Ho * Wo, 18)
        x1 = x1_full.reshape(Nb, H, W, planes)[:, ::stride, ::stride, :]
        x1 = x1.reshape(Nb, Ho, Wo * planes)

    # ---- deformable conv (outputs 0.5*dconv; bias folded into tail shift)
    wtile = _build_deform_weights(p["w_d"], W) * 0.5
    base = _build_base_coords(Ho, Wo, stride)
    lanex = jnp.repeat(jnp.arange(W, dtype=jnp.int32), Cin).reshape(1, W * Cin)
    dconv = _deform_call(x2d, off, wtile, base, lanex, H, W, Cin, Ho, Wo, cout)
    dconv = dconv.reshape(Nb, Ho, Wo * cout)           # free view

    # ---- conv2 + bn2 + relu + conv3 + bn3 + average, one fused kernel.
    w2_rows = _build_row_weights(p["w2"], Wo)
    w3_rows = _build_row_weights(p["w3"], Wo)
    s2_row = jnp.tile(scale2, Wo).reshape(1, Wo * planes)
    t2_row = jnp.tile(shift2, Wo).reshape(1, Wo * planes)
    s3_row = jnp.tile(0.5 * scale3, Wo).reshape(1, Wo * cout)
    t3_row = jnp.tile(0.5 * (shift3 + p["b_d"]), Wo).reshape(1, Wo * cout)
    out = _tail_call(x1, dconv, w2_rows, w3_rows, s2_row, t2_row, s3_row, t3_row,
                     Ho, Wo, planes, cout)

    out = out.reshape(Nb, Ho, Wo, cout)
    # TODO(synk): skip this NHWC->NCHW transpose if the surrounding net is NHWC.
    return jnp.transpose(out, (0, 3, 1, 2))


# --------------------------------------------------------------------------
# Pure-JAX reference (for correctness check)
# --------------------------------------------------------------------------
def _conv_ref(x, w_t, b, stride):
    w_hwio = jnp.transpose(w_t, (2, 3, 1, 0))
    y = lax.conv_general_dilated(x, w_hwio, (stride, stride), ((1, 1), (1, 1)),
                                 dimension_numbers=("NHWC", "HWIO", "NHWC"),
                                 precision=lax.Precision.HIGHEST)
    return y + b.reshape(1, 1, 1, -1)


def _deform_ref(x, off, w_t, b, stride):
    Nb, H, W, C = x.shape
    _, Ho, Wo, _ = off.shape
    Cout = w_t.shape[0]
    rows = jnp.arange(Ho, dtype=jnp.float32)[None, :, None]
    cols = jnp.arange(Wo, dtype=jnp.float32)[None, None, :]
    bidx = jnp.arange(Nb)[:, None, None]
    acc = jnp.zeros((Nb, Ho, Wo, Cout), jnp.float32)
    for k in range(9):
        ki, kj = k // 3, k % 3
        dy = off[..., 2 * k]
        dx = off[..., 2 * k + 1]
        py = rows * stride - 1 + ki + dy
        px = cols * stride - 1 + kj + dx
        y0 = jnp.floor(py)
        x0 = jnp.floor(px)
        fy = py - y0
        fx = px - x0
        y0i = y0.astype(jnp.int32)
        x0i = x0.astype(jnp.int32)
        sampled = jnp.zeros((Nb, Ho, Wo, C), jnp.float32)
        for yc, xc, wt in ((y0i, x0i, (1 - fy) * (1 - fx)),
                           (y0i, x0i + 1, (1 - fy) * fx),
                           (y0i + 1, x0i, fy * (1 - fx)),
                           (y0i + 1, x0i + 1, fy * fx)):
            valid = ((yc >= 0) & (yc < H) & (xc >= 0) & (xc < W)).astype(jnp.float32)
            yi = jnp.clip(yc, 0, H - 1)
            xi = jnp.clip(xc, 0, W - 1)
            vals = x[bidx, yi, xi]
            sampled = sampled + vals * (wt * valid)[..., None]
        wk = jnp.transpose(w_t[:, :, ki, kj])                  # (C, Cout)
        acc = acc + jnp.einsum("nijc,cd->nijd", sampled, wk, precision="highest")
    return acc + b.reshape(1, 1, 1, -1)


def def_block_ref(x_nchw, p, stride):
    x = jnp.transpose(x_nchw, (0, 2, 3, 1))
    offset = _conv_ref(x, p["w_off"], p["b_off"], stride)
    dconv = _deform_ref(x, offset, p["w_d"], p["b_d"], stride)
    x1 = _conv_ref(x, p["w1"], p["b1"], stride)
    x2 = _conv_ref(x1, p["w2"], p["b2"], 1)
    x2 = (x2 - p["m2"]) / jnp.sqrt(p["v2"] + EPS) * p["g2"] + p["bt2"]
    x2 = jnp.maximum(x2, 0.0)
    x3 = _conv_ref(x2, p["w3"], p["b3"], 1)
    x3 = (x3 - p["m3"]) / jnp.sqrt(p["v3"] + EPS) * p["g3"] + p["bt3"]
    out = (dconv + x3) * 0.5
    return jnp.transpose(out, (0, 3, 1, 2))


# --------------------------------------------------------------------------
if __name__ == "__main__":
    inplanes, planes = 4, 4
    B, H, W = 2, 16, 16
    stride = 1                                                 # downsampling=False
    cout = planes * 4

    key = jax.random.PRNGKey(0)
    ks = jax.random.split(key, 16)

    def nrm(k, shape, s=0.1):
        return s * jax.random.normal(k, shape, dtype=jnp.float32)

    params = {
        "w_off": nrm(ks[0], (18, inplanes, 3, 3)), "b_off": nrm(ks[1], (18,), 0.05),
        "w_d":   nrm(ks[2], (cout, inplanes, 3, 3)), "b_d": nrm(ks[3], (cout,), 0.05),
        "w1":    nrm(ks[4], (planes, inplanes, 3, 3)), "b1": nrm(ks[5], (planes,), 0.05),
        "w2":    nrm(ks[6], (planes, planes, 3, 3)), "b2": nrm(ks[7], (planes,), 0.05),
        "w3":    nrm(ks[8], (cout, planes, 3, 3)), "b3": nrm(ks[9], (cout,), 0.05),
        "g2":  1.0 + nrm(ks[10], (planes,)), "bt2": nrm(ks[11], (planes,)),
        "m2":  nrm(ks[12], (planes,)), "v2": 1.0 + jnp.abs(nrm(ks[13], (planes,))),
        "g3":  1.0 + nrm(ks[14], (cout,)), "bt3": nrm(ks[15], (cout,)),
        "m3":  jnp.zeros((cout,), jnp.float32) + 0.05,
        "v3":  jnp.ones((cout,), jnp.float32) * 1.2,
    }

    x = jax.random.normal(jax.random.PRNGKey(1), (B, inplanes, H, W), dtype=jnp.float32)

    out = def_block_pallas(x, params, stride)
    out = jax.block_until_ready(out)

    ref = jax.block_until_ready(def_block_ref(x, params, stride))
    np.testing.assert_allclose(np.asarray(out), np.asarray(ref), rtol=5e-3, atol=5e-3)
    assert out.shape == (B, cout, H, W)

    print("KERNEL_OK")
</pallas_src>

<mosaic_0001>
module attributes {stable_mosaic.version = 11 : i64} {
  func.func @_layer1_kernel(%arg0: i32, %arg1: memref<1x16x64xf32, #tpu.memory_space<vmem>>, %arg2: memref<3x64x288xf32, #tpu.memory_space<vmem>>, %arg3: memref<3x64x64xf32, #tpu.memory_space<vmem>>, %arg4: memref<1x288xf32, #tpu.memory_space<vmem>>, %arg5: memref<1x64xf32, #tpu.memory_space<vmem>>, %arg6: memref<1x16x288xf32, #tpu.memory_space<vmem>>, %arg7: memref<1x16x64xf32, #tpu.memory_space<vmem>>, %arg8: memref<18x64xf32, #tpu.memory_space<vmem>>) attributes {dimension_semantics = [#tpu.dimension_semantics<parallel>], iteration_bounds = array<i64: 2>, scalar_prefetch = 0 : i64, scratch_operands = 1 : i64, tpu.core_type = #tpu.core_type<tc>, window_params = [{transform_indices = @transform_0, window_bounds = array<i64: 1, 16, 64>}, {pipeline_mode = #tpu.pipeline_mode<synchronous>, transform_indices = @transform_1, window_bounds = array<i64: 3, 64, 288>}, {pipeline_mode = #tpu.pipeline_mode<synchronous>, transform_indices = @transform_2, window_bounds = array<i64: 3, 64, 64>}, {pipeline_mode = #tpu.pipeline_mode<synchronous>, transform_indices = @transform_3, window_bounds = array<i64: 1, 288>}, {pipeline_mode = #tpu.pipeline_mode<synchronous>, transform_indices = @transform_4, window_bounds = array<i64: 1, 64>}, {transform_indices = @transform_5, window_bounds = array<i64: 1, 16, 288>}, {transform_indices = @transform_6, window_bounds = array<i64: 1, 16, 64>}]} {
    %cst = arith.constant 0.000000e+00 : f32
    %0 = vector.broadcast %cst : f32 to vector<18x64xf32>
    %c0 = arith.constant 0 : index
    %c0_0 = arith.constant 0 : index
    %1 = vector.load %arg8[%c0, %c0_0] : memref<18x64xf32, #tpu.memory_space<vmem>>, vector<18x64xf32>
    tpu.vector_store %arg8[%c0, %c0_0], %0 {strides = array<i32>} : memref<18x64xf32, #tpu.memory_space<vmem>>, vector<18x64xf32>,
    %c0_1 = arith.constant 0 : index
    %c0_2 = arith.constant 0 : index
    %c0_3 = arith.constant 0 : index
    %2 = vector.load %arg1[%c0_1, %c0_2, %c0_3] : memref<1x16x64xf32, #tpu.memory_space<vmem>>, vector<1x16x64xf32>
    %3 = vector.shape_cast %2 : vector<1x16x64xf32> to vector<16x64xf32>
    %c1 = arith.constant 1 : index
    %c0_4 = arith.constant 0 : index
    %4 = vector.load %arg8[%c1, %c0_4] : memref<18x64xf32, #tpu.memory_space<vmem>>, vector<16x64xf32>
    tpu.vector_store %arg8[%c1, %c0_4], %3 {strides = array<i32>} : memref<18x64xf32, #tpu.memory_space<vmem>>, vector<16x64xf32>,
    %c0_5 = arith.constant 0 : index
    %c0_6 = arith.constant 0 : index
    %5 = vector.load %arg4[%c0_5, %c0_6] : memref<1x288xf32, #tpu.memory_space<vmem>>, vector<1x288xf32>
    %c0_7 = arith.constant 0 : index
    %c0_8 = arith.constant 0 : index
    %6 = vector.load %arg5[%c0_7, %c0_8] : memref<1x64xf32, #tpu.memory_space<vmem>>, vector<1x64xf32>
    %c0_9 = arith.constant 0 : index
    %c0_10 = arith.constant 0 : index
    %7 = vector.load %arg8[%c0_9, %c0_10] : memref<18x64xf32, #tpu.memory_space<vmem>>, vector<16x64xf32>
    %c0_11 = arith.constant 0 : index
    %c0_12 = arith.constant 0 : index
    %c0_13 = arith.constant 0 : index
    %8 = vector.load %arg2[%c0_11, %c0_12, %c0_13] : memref<3x64x288xf32, #tpu.memory_space<vmem>>, vector<1x64x288xf32>
    %9 = vector.shape_cast %8 : vector<1x64x288xf32> to vector<64x288xf32>
    %cst_14 = arith.constant dense<0.000000e+00> : vector<16x288xf32>
    %10 = tpu.matmul %7, %9, %cst_14 {dimension_numbers = #tpu.dot_dimension_numbers<[1], [0], [0], [1], [0, 0, 1, 1], [], []>} : vector<16x64xf32>, vector<64x288xf32>, vector<16x288xf32> -> vector<16x288xf32>
    %11 = vector.broadcast %5 : vector<1x288xf32> to vector<16x288xf32>
    %12 = arith.addf %11, %10 : vector<16x288xf32>
    %c0_15 = arith.constant 0 : index
    %c0_16 = arith.constant 0 : index
    %c0_17 = arith.constant 0 : index
    %13 = vector.load %arg3[%c0_15, %c0_16, %c0_17] : memref<3x64x64xf32, #tpu.memory_space<vmem>>, vector<1x64x64xf32>
    %14 = vector.shape_cast %13 : vector<1x64x64xf32> to vector<64x64xf32>
    %cst_18 = arith.constant dense<0.000000e+00> : vector<16x64xf32>
    %15 = tpu.matmul %7, %14, %cst_18 {dimension_numbers = #tpu.dot_dimension_numbers<[1], [0], [0], [1], [0, 0, 1, 1], [], []>} : vector<16x64xf32>, vector<64x64xf32>, vector<16x64xf32> -> vector<16x64xf32>
    %16 = vector.broadcast %6 : vector<1x64xf32> to vector<16x64xf32>
    %17 = arith.addf %16, %15 : vector<16x64xf32>
    %c1_19 = arith.constant 1 : index
    %c0_20 = arith.constant 0 : index
    %18 = vector.load %arg8[%c1_19, %c0_20] : memref<18x64xf32, #tpu.memory_space<vmem>>, vector<16x64xf32>
    %c1_21 = arith.constant 1 : index
    %c0_22 = arith.constant 0 : index
    %c0_23 = arith.constant 0 : index
    %19 = vector.load %arg2[%c1_21, %c0_22, %c0_23] : memref<3x64x288xf32, #tpu.memory_space<vmem>>, vector<1x64x288xf32>
    %20 = vector.shape_cast %19 : vector<1x64x288xf32> to vector<64x288xf32>
    %cst_24 = arith.constant dense<0.000000e+00> : vector<16x288xf32>
    %21 = tpu.matmul %18, %20, %cst_24 {dimension_numbers = #tpu.dot_dimension_numbers<[1], [0], [0], [1], [0, 0, 1, 1], [], []>} : vector<16x64xf32>, vector<64x288xf32>, vector<16x288xf32> -> vector<16x288xf32>
    %22 = arith.addf %12, %21 : vector<16x288xf32>
    %c1_25 = arith.constant 1 : index
    %c0_26 = arith.constant 0 : index
    %c0_27 = arith.constant 0 : index
    %23 = vector.load %arg3[%c1_25, %c0_26, %c0_27] : memref<3x64x64xf32, #tpu.memory_space<vmem>>, vector<1x64x64xf32>
    %24 = vector.shape_cast %23 : vector<1x64x64xf32> to vector<64x64xf32>
    %cst_28 = arith.constant dense<0.000000e+00> : vector<16x64xf32>
    %25 = tpu.matmul %18, %24, %cst_28 {dimension_numbers = #tpu.dot_dimension_numbers<[1], [0], [0], [1], [0, 0, 1, 1], [], []>} : vector<16x64xf32>, vector<64x64xf32>, vector<16x64xf32> -> vector<16x64xf32>
    %26 = arith.addf %17, %25 : vector<16x64xf32>
    %c2 = arith.constant 2 : index
    %c0_29 = arith.constant 0 : index
    %27 = vector.load %arg8[%c2, %c0_29] : memref<18x64xf32, #tpu.memory_space<vmem>>, vector<16x64xf32>
    %c2_30 = arith.constant 2 : index
    %c0_31 = arith.constant 0 : index
    %c0_32 = arith.constant 0 : index
    %28 = vector.load %arg2[%c2_30, %c0_31, %c0_32] : memref<3x64x288xf32, #tpu.memory_space<vmem>>, vector<1x64x288xf32>
    %29 = vector.shape_cast %28 : vector<1x64x288xf32> to vector<64x288xf32>
    %cst_33 = arith.constant dense<0.000000e+00> : vector<16x288xf32>
    %30 = tpu.matmul %27, %29, %cst_33 {dimension_numbers = #tpu.dot_dimension_numbers<[1], [0], [0], [1], [0, 0, 1, 1], [], []>} : vector<16x64xf32>, vector<64x288xf32>, vector<16x288xf32> -> vector<16x288xf32>
    %31 = arith.addf %22, %30 : vector<16x288xf32>
    %c2_34 = arith.constant 2 : index
    %c0_35 = arith.constant 0 : index
    %c0_36 = arith.constant 0 : index
    %32 = vector.load %arg3[%c2_34, %c0_35, %c0_36] : memref<3x64x64xf32, #tpu.memory_space<vmem>>, vector<1x64x64xf32>
    %33 = vector.shape_cast %32 : vector<1x64x64xf32> to vector<64x64xf32>
    %cst_37 = arith.constant dense<0.000000e+00> : vector<16x64xf32>
    %34 = tpu.matmul %27, %33, %cst_37 {dimension_numbers = #tpu.dot_dimension_numbers<[1], [0], [0], [1], [0, 0, 1, 1], [], []>} : vector<16x64xf32>, vector<64x64xf32>, vector<16x64xf32> -> vector<16x64xf32>
    %35 = arith.addf %26, %34 : vector<16x64xf32>
    %c0_38 = arith.constant 0 : index
    %c0_39 = arith.constant 0 : index
    %c0_40 = arith.constant 0 : index
    %36 = vector.load %arg6[%c0_38, %c0_39, %c0_40] : memref<1x16x288xf32, #tpu.memory_space<vmem>>, vector<1x16x288xf32>
    %37 = vector.shape_cast %36 : vector<1x16x288xf32> to vector<16x288xf32>
    %38 = vector.shape_cast %31 : vector<16x288xf32> to vector<1x16x288xf32>
    tpu.vector_store %arg6[%c0_38, %c0_39, %c0_40], %38 {strides = array<i32>} : memref<1x16x288xf32, #tpu.memory_space<vmem>>, vector<1x16x288xf32>,
    %c0_41 = arith.constant 0 : index
    %c0_42 = arith.constant 0 : index
    %c0_43 = arith.constant 0 : index
    %39 = vector.load %arg7[%c0_41, %c0_42, %c0_43] : memref<1x16x64xf32, #tpu.memory_space<vmem>>, vector<1x16x64xf32>
    %40 = vector.shape_cast %39 : vector<1x16x64xf32> to vector<16x64xf32>
    %41 = vector.shape_cast %35 : vector<16x64xf32> to vector<1x16x64xf32>
    tpu.vector_store %arg7[%c0_41, %c0_42, %c0_43], %41 {strides = array<i32>} : memref<1x16x64xf32, #tpu.memory_space<vmem>>, vector<1x16x64xf32>,
    return
  }
  func.func @transform_0(%arg0: i32) -> (i32, i32, i32) {
    %c0_i32 = arith.constant 0 : i32
    %c0_i32_0 = arith.constant 0 : i32
    %c0_i32_1 = arith.constant 0 : i32
    return %arg0, %c0_i32, %c0_i32_0 : i32, i32, i32
  }
  func.func @transform_1(%arg0: i32) -> (i32, i32, i32) {
    %c0_i32 = arith.constant 0 : i32
    %c0_i32_0 = arith.constant 0 : i32
    %c0_i32_1 = arith.constant 0 : i32
    %c0_i32_2 = arith.constant 0 : i32
    return %c0_i32, %c0_i32_0, %c0_i32_1 : i32, i32, i32
  }
  func.func @transform_2(%arg0: i32) -> (i32, i32, i32) {
    %c0_i32 = arith.constant 0 : i32
    %c0_i32_0 = arith.constant 0 : i32
    %c0_i32_1 = arith.constant 0 : i32
    %c0_i32_2 = arith.constant 0 : i32
    return %c0_i32, %c0_i32_0, %c0_i32_1 : i32, i32, i32
  }
  func.func @transform_3(%arg0: i32) -> (i32, i32) {
    %c0_i32 = arith.constant 0 : i32
    %c0_i32_0 = arith.constant 0 : i32
    %c0_i32_1 = arith.constant 0 : i32
    return %c0_i32, %c0_i32_0 : i32, i32
  }
  func.func @transform_4(%arg0: i32) -> (i32, i32) {
    %c0_i32 = arith.constant 0 : i32
    %c0_i32_0 = arith.constant 0 : i32
    %c0_i32_1 = arith.constant 0 : i32
    return %c0_i32, %c0_i32_0 : i32, i32
  }
  func.func @transform_5(%arg0: i32) -> (i32, i32, i32) {
    %c0_i32 = arith.constant 0 : i32
    %c0_i32_0 = arith.constant 0 : i32
    %c0_i32_1 = arith.constant 0 : i32
    return %arg0, %c0_i32, %c0_i32_0 : i32, i32, i32
  }
  func.func @transform_6(%arg0: i32) -> (i32, i32, i32) {
    %c0_i32 = arith.constant 0 : i32
    %c0_i32_0 = arith.constant 0 : i32
    %c0_i32_1 = arith.constant 0 : i32
    return %arg0, %c0_i32, %c0_i32_0 : i32, i32, i32
  }
}

</mosaic_0001>

<bundles_post_ra>
// kernel: tpu_custom_call.1
= control target key start
LH: loop header
LB: loop body
LE: loop exit
PB: predicated region body
PF: predicated region fallthrough
CT: control target
= control target key end

     0   :  { %12 = vsyncpa [#allocation4], 0  ;;  %s1616_s0 = inlined_call_operand.hbm [shape: f32[2,16,64], index: 0, kind: input, shape index: {}]   ;;  %s1617_s1 = inlined_call_operand.hbm [shape: f32[3,64,288], index: 1, kind: input, shape index: {}]   ;;  %s1618_s2 = inlined_call_operand.hbm [shape: f32[3,64,64], index: 2, kind: input, shape index: {}]   ;;  %s1619_s3 = inlined_call_operand.hbm [shape: f32[1,288], index: 3, kind: input, shape index: {}]   ;;  %s1620_s4 = inlined_call_operand.vmem [shape: f32[1,64], index: 4, kind: input, shape index: {}]   ;;  %s1621_s5 = inlined_call_operand.hbm [shape: f32[2,16,288], index: 5, kind: output, shape index: {0}]   ;;  %s1622_s6 = inlined_call_operand.hbm [shape: f32[2,16,64], index: 6, kind: output, shape index: {1}]  }
   0x1   :  { %14 = vsyncpa [#allocation4 + $0x1], 0 }
   0x2   :  { %15 = vsyncpa [#allocation7], 0 }
   0x3   :  { %16 = vsyncpa [#allocation10], 0 }
   0x4   :  { %17 = vsyncpa [#allocation5], 0 }
   0x5   :  { %19 = vsyncpa [#allocation5 + $0x1], 0 }
   0x6   :  { %20 = vsyncpa [#allocation13], 0 }
   0x7   :  { %22 = vsyncpa [#allocation13 + $0x1], 0  ;;  %s1374_s21 = smov 0   ;;  %s1376_s22 = smov 0  }
   0x8   :  { %s1378_s23 = smov 0   ;;  %s1380_s24 = smov 0  }
   0x9 LB: > { %s1395_s25 = sadd.s32 4294967295, %s1325_s24   ;;  %s958_s26 = sadd.s32 4294967294, %s1325_s24   ;;  %s1325_s24 = sphi %s1380_s24, %s1637_s24   ;;  %s1321_s23 = sphi %s1378_s23, %s1636_s23   ;;  %s1317_s22 = sphi %s1376_s22, %s1635_s22   ;;  %s1313_s21 = sphi %s1374_s21, %s1634_s21  }
   0xa   : > { %p48_p0 = scmp.ne.s32.totalorder %s1317_s22, %s1313_s21  ;;  %p49_p1 = scmp.eq.s32.totalorder %s1395_s25, 0 }
   0xb   : > { %p156_p2 = scmp.eq.s32.totalorder %s1395_s25, 1  ;;  %p162_p3 = scmp.eq.s32.totalorder %s958_s26, 1 }
   0xc   : > { %p1404_p4 = por %p49_p1, %p48_p0  ;;  %p959_p5 = scmp.ge.s32.totalorder %s1325_s24, 1 }
   0xd   : > { %p1409_p6 = por %p162_p3, %p48_p0  ;;  %p195_p7 = scmp.lt.s32.totalorder %s1325_s24, 3 }
   0xe   : > { %s206_s7 = sshll.u32 %s1617_s1, 4  ;;  %s1327_s9 = smov [#allocation6]   ;;  %s207_s7 = int_to_ptr.hbm [resolvable:$true] %s206_s7 }
   0xf   : > { %p1417_p8 = pnand %p959_p5, %p195_p7  ;;  %s208_s10 = sshll.u32 %s1327_s9, 4  ;;  %s209_s10 = int_to_ptr.vmem [resolvable:$true] %s208_s10 }
  0x10   : > { %s220_s14 = sshll.u32 %s1618_s2, 4  ;;  %s1328_s15 = smov 384   ;;  %s221_s14 = int_to_ptr.hbm [resolvable:$true] %s220_s14 }
  0x11   : > { %p1025_p9 = pneg %p1417_p8  ;;  %s1329_s16 = smov 24  }
  0x12   : > { %s1330_s17 = smov [#allocation8]   ;;  %s1623_s19 = smov 128  }
  0x13   : > { %p1425_p10 = pnand %p1025_p9, %p49_p1  ;;  %s222_s18 = sshll.u32 %s1330_s17, 4  ;;  %s223_s18 = int_to_ptr.vmem [resolvable:$true] %s222_s18 }
  0x14   : > { %s1624_s20 = smov 8   ;;  %s235_s30 = sshll.u32 %s1619_s3, 4  ;;  %s236_s30 = int_to_ptr.hbm [resolvable:$true] %s235_s30 }
  0x15   : > { %1028 = dma.hbm_to_vmem [thread:$0]  (!%p1425_p10), %s207_s7, 9216, %s209_s10, [#allocation7], %s1328_s15, %s1328_s15, %s1329_s16  }
  0x16   : > { %1031 = dma.hbm_to_vmem [thread:$0]  (!%p1425_p10), %s221_s14, 3072, %s223_s18, [#allocation7], %s1623_s19, %s1623_s19, %s1624_s20  }
  0x17   : > { %s1333_s7 = smov [#allocation9]   ;;  %s1446_s10 = sadd.s32 1, %s1325_s24  }
  0x18   : > { %s237_s9 = sshll.u32 %s1333_s7, 4  ;;  %s32_s12 = ssub.s32 %s1325_s24, %s1446_s10  ;;  %s238_s9 = int_to_ptr.vmem [resolvable:$true] %s237_s9 }
  0x19   : > { %1034 = dma.hbm_to_vmem [thread:$0]  (!%p1425_p10), %s236_s30, 48, %s238_s9, [#allocation10]  }
  0x1a   : > { %s35_s13 = sadd.s32 1, %s1321_s23  ;;  %p33_p12 = scmp.eq.s32.totalorder %s32_s12, 0 }
  0x1b   : > { %p42_p13 = scmp.ne.s32.totalorder %s1321_s23, %s1317_s22  ;;  %p43_p0 = scmp.eq.s32.totalorder %s1325_s24, 0 }
  0x1c   : > { %s1455_s14 = scalar_select %p33_p12, %s1321_s23, %s35_s13  }
  0x1d   : > { %p1459_p3 = por %p156_p2, %p42_p13  ;;  %p1049_p5 = scmp.lt.s32.totalorder %s1325_s24, 2 }
  0x1e   : > { %s251_s16 = sand.u32 1, %s1321_s23   ;;  %s1003_s17 = sshll.u32 %s1325_s24, 4 }
  0x1f   : > { %p44_p7 = por %p43_p0, %p42_p13  ;;  %s964_s11 = sshll.u32 %s251_s16, 4 }
  0x20   : > { %s260_s29 = scalar_lea.hbm %s1616_s0, %s1003_s17  ;;  %s255_s7 = scalar_lea.vmem [#allocation3], %s964_s11 }
  0x21   : > { %s261_s30 = sshll.u32 %s260_s29, 4  ;;  %s263_s9 = sshll.u32 %s255_s7, 4  ;;  %s262_s30 = int_to_ptr.hbm [resolvable:$true] %s261_s30  ;;  %s264_s9 = int_to_ptr.vmem [resolvable:$true] %s263_s9 }
  0x22   : > { %p1469_p9 = pnand %p1049_p5, %p44_p7  ;;  %s252_s13 = scalar_lea.sflag [#allocation4], %s251_s16 }
  0x23   : > { %s1189_s19 = sshra.s32 %s262_s30, 4  ;;  %s1196_s11 = scalar_lea.hbm %s1616_s0, 32  ;;  %s1190_s19 = int_to_ptr.hbm [resolvable:$true] %s1189_s19 }
  0x24   : > { %s1191_s20 = scalar_lea.hbm %s1190_s19, 16  ;;  %p1193_p10 = pneg %p1469_p9 }
  0x25   : > { %p1192_p2 = scmp.ne.s32.totalorder %s1190_s19, %s1191_s20  ;;  %p1197_p0 = scmp.lt.s32.totalorder %s1190_s19, %s1616_s0 }
  0x26   : > { %p1198_p5 = scmp.lt.s32.totalorder %s1196_s11, %s1191_s20 }
  0x27   : > { %p1194_p12 = pnand %p1193_p10, %p1192_p2 }
  0x28   : > { %p1199_p7 = por %p1198_p5, %p1197_p0 }
  0x29   : > { %p1195_p13 = pneg %p1194_p12 }
  0x2b   : > { %p1200_p11 = pnand %p1199_p7, %p1195_p13 }
  0x2d   : > { %1203 = shalt.err (!%p1200_p11)
}
  0x2e   : > { %s1631_s16 = smov 8   ;;  %s1632_s7 = smov 128  }
  0x2f   : > { %1038 = dma.hbm_to_vmem [thread:$0]  (!%p1469_p9), %s262_s30, 256, %s264_s9, %s252_s13, %s1632_s7, %s1632_s7, %s1631_s16  }
  0x30   : > { %275 = sbr.rel (%p1417_p8) target bundleno = 276 (0x114), region = 40  ;;  %s1489_s17 = sand.u32 (!%p1417_p8), 1, %s1317_s22  }
  0x31   : > { %s968_s19 = sshll.u32 (!%p1417_p8), %s1489_s17, 4  ;;  %s278_s20 = scalar_lea.sflag (!%p1417_p8), [#allocation4], %s1489_s17 }
  0x32   : > { %s1495_s18 = scalar_lea.vmem (!%p1417_p8), [#allocation3], %s968_s19 }
  0x35   : > { %1292 = dma.done.wait (%p1404_p4), %s278_s20, 256  }
  0x36   : > { %1294 = vsyncadd (%p1404_p4), %s278_s20, 4294967040 }
  0x37   : > { %1296 = dma.done.wait (%p49_p1), [#allocation7], 12288  }
  0x38   : > { %1298 = vsyncadd (%p49_p1), [#allocation7], 4294955008 }
  0x39   : > { %1300 = dma.done.wait (%p49_p1), [#allocation10], 48  }
  0x3a   : > { %1302 = vsyncadd (%p49_p1), [#allocation10], 4294967248  ;;  %vm331_vm0 = vcmask 523264   ;;  %vm334_vm1 = vcmask 517120   ;;  %v1334_v0 = vmov 0.0   ;;  %v365_v1 = vld [vmem:[#allocation6 + $0xa8] sm:$0xff] }
  0x3b   : > { %332 = vst.msk [vmem:[#allocation2] sm:$0xff] %vm331_vm0, %v1334_v0  ;;  %v366_v2 = vld [vmem:[#allocation6 + $0xb0] sm:$0xff]  ;;  %v367_v3 = vld [vmem:[#allocation6 + $0xb8] sm:$0xff]  ;;  %382 = vmatpush.msra.mxu0 %v365_v1  ;;  %v364_v7 = vld [vmem:[#allocation6 + $0xa0] sm:$0xff]  ;;  %s1005_s27 = smul.u32 48, %s1489_s17  ;;  %vm778_vm2 = vcmask 261120  }
  0x3c   : > { %333 = vst.msk [vmem:[#allocation2 + $0x8] sm:$0xff] %vm331_vm0, %v1334_v0  ;;  %405 = vmatpush.msra.mxu1 %v366_v2  ;;  %v463_v4 = vld [vmem:[#allocation8 + $0x38] sm:$0xff]  ;;  %v362_v5 = vld [vmem:[#allocation6 + $0x90] sm:$0xff]  ;;  %428 = vmatpush.msra.mxu2 %v367_v3  ;;  %v360_v10 = vld [vmem:[#allocation6 + $0x80] sm:$0xff]  ;;  %s1006_s12 = smul.u32 48, %s1395_s25  ;;  %s1004_s13 = sshll.u32 %s1395_s25, 4 }
  0x3d   : > { %335 = vst.msk [vmem:[#allocation2 + $0x10] sm:$0x3] %vm334_vm1, %v1334_v0  ;;  %v363_v6 = vld [vmem:[#allocation6 + $0x98] sm:$0xff]  ;;  %472 = vmatpush.msra.mxu3 %v463_v4  ;;  %v462_v8 = vld [vmem:[#allocation8 + $0x30] sm:$0xff]  ;;  %383 = vmatpush.msra.mxu0 %v362_v5  ;;  %v361_v11 = vld [vmem:[#allocation6 + $0x88] sm:$0xff]  ;;  %s1543_s9 = scalar_lea.vmem [#allocation11], %s1005_s27  ;;  %s819_s8 = scalar_lea.hbm %s1622_s6, %s1004_s13 }
  0x3e   : > { %v359_v9 = vld [vmem:[#allocation6 + $0x78] sm:$0xff]  ;;  %406 = vmatpush.msra.mxu1 %v363_v6  ;;  %v461_v12 = vld [vmem:[#allocation8 + $0x28] sm:$0xff]  ;;  %429 = vmatpush.msra.mxu2 %v364_v7  ;;  %v356_v13 = vld [vmem:[#allocation6 + $0x60] sm:$0xff]  ;;  %s802_s29 = scalar_lea.hbm %s1621_s5, %s1006_s12  ;;  %s803_s16 = sshll.u32 %s1543_s9, 4  ;;  %s1562_s16 = int_to_ptr.vmem [resolvable:$true] %s803_s16 }
  0x3f   : > { %473 = vmatpush.msra.mxu3 %v462_v8  ;;  %v357_v14 = vld [vmem:[#allocation6 + $0x68] sm:$0xff]  ;;  %384 = vmatpush.msra.mxu0 %v359_v9  ;;  %v358_v15 = vld [vmem:[#allocation6 + $0x70] sm:$0xff]  ;;  %v460_v16 = vld [vmem:[#allocation8 + $0x20] sm:$0xff]  ;;  %s330_s7 = scalar_lea.vmem [#allocation12], %s968_s19  ;;  %s805_s25 = sshll.u32 %s802_s29, 4  ;;  %s806_s25 = int_to_ptr.hbm [resolvable:$true] %s805_s25 }
  0x40   : > { %407 = vmatpush.msra.mxu1 %v360_v10  ;;  %430 = vmatpush.msra.mxu2 %v361_v11  ;;  %v353_v17 = vld [vmem:[#allocation6 + $0x48] sm:$0xff]  ;;  %v354_v18 = vld [vmem:[#allocation6 + $0x50] sm:$0xff]  ;;  %v355_v19 = vld [vmem:[#allocation6 + $0x58] sm:$0xff]  ;;  %s820_s20 = sshll.u32 %s330_s7, 4  ;;  %s822_s19 = sshll.u32 %s819_s8, 4  ;;  %s1565_s20 = int_to_ptr.vmem [resolvable:$true] %s820_s20  ;;  %s1567_s19 = int_to_ptr.hbm [resolvable:$true] %s822_s19 }
  0x41   : > { %474 = vmatpush.msra.mxu3 %v461_v12  ;;  %385 = vmatpush.msra.mxu0 %v356_v13  ;;  %v459_v20 = vld [vmem:[#allocation8 + $0x18] sm:$0xff]  ;;  %v350_v21 = vld [vmem:[#allocation6 + $0x30] sm:$0xff]  ;;  %v352_v23 = vld [vmem:[#allocation6 + $0x40] sm:$0xff]  ;;  %s786_s30 = scalar_lea.sflag [#allocation5], %s1489_s17  ;;  %s1233_s12 = sshra.s32 %s806_s25, 4  ;;  %s1234_s12 = int_to_ptr.hbm [resolvable:$true] %s1233_s12 }
  0x42   : > { %408 = vmatpush.msra.mxu1 %v357_v14  ;;  %431 = vmatpush.msra.mxu2 %v358_v15  ;;  %v351_v22 = vld [vmem:[#allocation6 + $0x38] sm:$0xff]  ;;  %v458_v24 = vld [vmem:[#allocation8 + $0x10] sm:$0xff]  ;;  %v348_v26 = vld [vmem:[#allocation6 + $0x20] sm:$0xff]  ;;  %s1235_s13 = scalar_lea.hbm %s1234_s12, 48  ;;  %s1239_s29 = scalar_lea.hbm %s1621_s5, 96 }
  0x43   : > { %475 = vmatpush.msra.mxu3 %v460_v16  ;;  %386 = vmatpush.msra.mxu0 %v353_v17  ;;  %v347_v25 = vld [vmem:[#allocation6 + $0x18] sm:$0xff]  ;;  %v336_v27 = vld [vmem:[%s1495_s18] sm:$0xff]  ;;  %v349_v28 = vld [vmem:[#allocation6 + $0x28] sm:$0xff]  ;;  %p1236_p1 = scmp.ne.s32.totalorder %s1234_s12, %s1235_s13  ;;  %p1240_p11 = scmp.lt.s32.totalorder %s1234_s12, %s1621_s5 }
  0x44   : > { %409 = vmatpush.msra.mxu1 %v354_v18  ;;  %432 = vmatpush.msra.mxu2 %v355_v19  ;;  %v457_v29 = vld [vmem:[#allocation8 + $0x8] sm:$0xff]  ;;  %338 = vst.msk [vmem:[#allocation2 + $0x1] sm:$0xff] %vm331_vm0, %v336_v27  ;;  %v344_v30 = vld [vmem:[#allocation6] sm:$0xff]  ;;  %v346_v32 = vld [vmem:[#allocation6 + $0x10] sm:$0xff]  ;;  %p1241_p9 = scmp.lt.s32.totalorder %s1239_s29, %s1235_s13 }
  0x45   : > { %476 = vmatpush.msra.mxu3 %v459_v20  ;;  %387 = vmatpush.msra.mxu0 %v350_v21  ;;  %v345_v31 = vld [vmem:[#allocation6 + $0x8] sm:$0xff]  ;;  %v456_v33 = vld [vmem:[#allocation8] sm:$0xff]  ;;  %v518_v34 = vld [vmem:[#allocation6 + $0x178] sm:$0xff]  ;;  %p1237_p4 = pnand %p1236_p1, %p1459_p3 }
  0x46   : > { %410 = vmatpush.msra.mxu1 %v351_v22  ;;  %433 = vmatpush.msra.mxu2 %v352_v23  ;;  %v608_v35 = vld [vmem:[#allocation8 + $0x78] sm:$0xff]  ;;  %v516_v36 = vld [vmem:[#allocation6 + $0x168] sm:$0xff]  ;;  %v517_v37 = vld [vmem:[#allocation6 + $0x170] sm:$0xff]  ;;  %p1242_p2 = por %p1241_p9, %p1240_p11 }
  0x47   : > { %477 = vmatpush.msra.mxu3 %v458_v24  ;;  %388 = vmatpush.msra.mxu0 %v347_v25  ;;  %v337_v38 = vld [vmem:[%s1495_s18 + $0x8] sm:$0xff]  ;;  %v515_v40 = vld [vmem:[#allocation6 + $0x160] sm:$0xff]  ;;  %v607_v41 = vld [vmem:[#allocation8 + $0x70] sm:$0xff]  ;;  %p1238_p8 = pneg %p1237_p4 }
  0x48   : > { %411 = vmatpush.msra.mxu1 %v348_v26  ;;  %434 = vmatpush.msra.mxu2 %v349_v28  ;;  %339 = vst.msk [vmem:[#allocation2 + $0x9] sm:$0xff] %vm331_vm0, %v337_v38  ;;  %v513_v42 = vld [vmem:[#allocation6 + $0x150] sm:$0xff]  ;;  %v514_v43 = vld [vmem:[#allocation6 + $0x158] sm:$0xff]  ;;  %v512_v44 = vld [vmem:[#allocation6 + $0x148] sm:$0xff] }
  0x49   : > { %478 = vmatpush.msra.mxu3 %v457_v29  ;;  %389 = vmatpush.msra.mxu0 %v344_v30  ;;  %v606_v45 = vld [vmem:[#allocation8 + $0x68] sm:$0xff]  ;;  %v510_v46 = vld [vmem:[#allocation6 + $0x138] sm:$0xff]  ;;  %v511_v47 = vld [vmem:[#allocation6 + $0x140] sm:$0xff]  ;;  %p1243_p10 = pnand %p1242_p2, %p1238_p8 }
  0x4a   : > { %412 = vmatpush.msra.mxu1 %v345_v31  ;;  %435 = vmatpush.msra.mxu2 %v346_v32  ;;  %v509_v48 = vld [vmem:[#allocation6 + $0x130] sm:$0xff]  ;;  %v605_v49 = vld [vmem:[#allocation8 + $0x60] sm:$0xff]  ;;  %v508_v51 = vld [vmem:[#allocation6 + $0x128] sm:$0xff] }
  0x4b   : > { %479 = vmatpush.msra.mxu3 %v456_v33  ;;  %v342_v39 = vld [vmem:[#allocation2] sm:$0xff]  ;;  %533 = vmatpush.msrb.mxu0 %v516_v36  ;;  %v507_v50 = vld [vmem:[#allocation6 + $0x120] sm:$0xff]  ;;  %v506_v53 = vld [vmem:[#allocation6 + $0x118] sm:$0xff] }
  0x4c   : > { %579 = vmatpush.msrb.mxu2 %v518_v34  ;;  %556 = vmatpush.msrb.mxu1 %v517_v37  ;;  %v604_v54 = vld [vmem:[#allocation8 + $0x58] sm:$0xff]  ;;  %v504_v55 = vld [vmem:[#allocation6 + $0x108] sm:$0xff]  ;;  %v505_v56 = vld [vmem:[#allocation6 + $0x110] sm:$0xff] }
  0x4d   : > { %617 = vmatpush.msrb.mxu3 %v608_v35  ;;  %973 = vmatmul.msk.f32.vlgmr.msra.gmra.mxu0 %vm331_vm0, %v342_v39  ;;  %v503_v57 = vld [vmem:[#allocation6 + $0x100] sm:$0xff]  ;;  %v603_v58 = vld [vmem:[#allocation8 + $0x50] sm:$0xff]  ;;  %v502_v60 = vld [vmem:[#allocation6 + $0xf8] sm:$0xff] }
  0x4e   : > { %975 = vmatmul.msk.f32.vlgmr.msra.gmra.mxu1 %vm331_vm0, %v342_v39  ;;  %977 = vmatmul.msk.f32.vlgmr.msra.gmra.mxu2 %vm331_vm0, %v342_v39  ;;  %v501_v59 = vld [vmem:[#allocation6 + $0xf0] sm:$0xff]  ;;  %v500_v61 = vld [vmem:[#allocation6 + $0xe8] sm:$0xff]  ;;  %v498_v63 = vld [vmem:[#allocation6 + $0xd8] sm:$0xff] }
  0x4f   : > { %979 = vmatmul.msk.f32.vlgmr.msra.gmra.mxu3 %vm331_vm0, %v342_v39  ;;  %580 = vmatpush.msrb.mxu2 %v515_v40  ;;  %v343_v52 = vld [vmem:[#allocation2 + $0x8] sm:$0xff]  ;;  %v602_v62 = vld [vmem:[#allocation8 + $0x48] sm:$0xff]  ;;  %v499_v0 = vld [vmem:[#allocation6 + $0xe0] sm:$0xff] }
  0x50   : > { %618 = vmatpush.msrb.mxu3 %v607_v41  ;;  %534 = vmatpush.msrb.mxu0 %v513_v42  ;;  %v497_v1 = vld [vmem:[#allocation6 + $0xd0] sm:$0xff]  ;;  %v601_v2 = vld [vmem:[#allocation8 + $0x40] sm:$0xff]  ;;  %v496_v4 = vld [vmem:[#allocation6 + $0xc8] sm:$0xff] }
  0x51   : > { %557 = vmatpush.msrb.mxu1 %v514_v43  ;;  %581 = vmatpush.msrb.mxu2 %v512_v44  ;;  %v495_v3 = vld [vmem:[#allocation6 + $0xc0] sm:$0xff]  ;;  %v492_v5 = vld [vmem:[#allocation2 + $0x1] sm:$0xff]  ;;  %v660_v6 = vld [vmem:[#allocation6 + $0x238] sm:$0xff] }
  0x52   : > { %619 = vmatpush.msrb.mxu3 %v606_v45  ;;  %535 = vmatpush.msrb.mxu0 %v510_v46  ;;  %v750_v7 = vld [vmem:[#allocation8 + $0xb8] sm:$0xff]  ;;  %v658_v8 = vld [vmem:[#allocation6 + $0x228] sm:$0xff]  ;;  %v659_v9 = vld [vmem:[#allocation6 + $0x230] sm:$0xff] }
  0x53   : > { %558 = vmatpush.msrb.mxu1 %v511_v47  ;;  %582 = vmatpush.msrb.mxu2 %v509_v48  ;;  %v657_v10 = vld [vmem:[#allocation6 + $0x220] sm:$0xff]  ;;  %v749_v11 = vld [vmem:[#allocation8 + $0xb0] sm:$0xff]  ;;  %v656_v13 = vld [vmem:[#allocation6 + $0x218] sm:$0xff] }
  0x54   : > { %620 = vmatpush.msrb.mxu3 %v605_v49  ;;  %536 = vmatpush.msrb.mxu0 %v507_v50  ;;  %v655_v12 = vld [vmem:[#allocation6 + $0x210] sm:$0xff]  ;;  %v654_v14 = vld [vmem:[#allocation6 + $0x208] sm:$0xff]  ;;  %v652_v16 = vld [vmem:[#allocation6 + $0x1f8] sm:$0xff] }
  0x55   : > { %559 = vmatpush.msrb.mxu1 %v508_v51  ;;  %974 = vmatmul.msk.f32.gmra.mxu0 %vm331_vm0, %v343_v52  ;;  %v748_v15 = vld [vmem:[#allocation8 + $0xa8] sm:$0xff]  ;;  %v653_v17 = vld [vmem:[#allocation6 + $0x200] sm:$0xff]  ;;  %v651_v18 = vld [vmem:[#allocation6 + $0x1f0] sm:$0xff] }
  0x56   : > { %976 = vmatmul.msk.f32.gmra.mxu1 %vm331_vm0, %v343_v52  ;;  %978 = vmatmul.msk.f32.gmra.mxu2 %vm331_vm0, %v343_v52  ;;  %v747_v19 = vld [vmem:[#allocation8 + $0xa0] sm:$0xff]  ;;  %v650_v21 = vld [vmem:[#allocation6 + $0x1e8] sm:$0xff]  ;;  %v493_v22 = vld [vmem:[#allocation2 + $0x9] sm:$0xff] }
  0x57   : > { %980 = vmatmul.msk.f32.gmra.mxu3 %vm331_vm0, %v343_v52  ;;  %583 = vmatpush.msrb.mxu2 %v506_v53  ;;  %v649_v20 = vld [vmem:[#allocation6 + $0x1e0] sm:$0xff]  ;;  %v648_v23 = vld [vmem:[#allocation6 + $0x1d8] sm:$0xff]  ;;  %v646_v25 = vld [vmem:[#allocation6 + $0x1c8] sm:$0xff] }
  0x58   : > { %621 = vmatpush.msrb.mxu3 %v604_v54  ;;  %537 = vmatpush.msrb.mxu0 %v504_v55  ;;  %v746_v24 = vld [vmem:[#allocation8 + $0x98] sm:$0xff]  ;;  %v647_v26 = vld [vmem:[#allocation6 + $0x1d0] sm:$0xff]  ;;  %v645_v27 = vld [vmem:[#allocation6 + $0x1c0] sm:$0xff] }
  0x59   : > { %560 = vmatpush.msrb.mxu1 %v505_v56  ;;  %584 = vmatpush.msrb.mxu2 %v503_v57  ;;  %v745_v28 = vld [vmem:[#allocation8 + $0x90] sm:$0xff]  ;;  %v644_v30 = vld [vmem:[#allocation6 + $0x1b8] sm:$0xff]  ;;  %v642_v31 = vld [vmem:[#allocation6 + $0x1a8] sm:$0xff] }
  0x5a   : > { %622 = vmatpush.msrb.mxu3 %v603_v58  ;;  %538 = vmatpush.msrb.mxu0 %v501_v59  ;;  %v643_v29 = vld [vmem:[#allocation6 + $0x1b0] sm:$0xff]  ;;  %v744_v32 = vld [vmem:[#allocation8 + $0x88] sm:$0xff]  ;;  %v640_v33 = vld [vmem:[#allocation6 + $0x198] sm:$0xff] }
  0x5b   : > { %561 = vmatpush.msrb.mxu1 %v502_v60  ;;  %585 = vmatpush.msrb.mxu2 %v500_v61  ;;  %v641_v34 = vld [vmem:[#allocation6 + $0x1a0] sm:$0xff]  ;;  %v639_v35 = vld [vmem:[#allocation6 + $0x190] sm:$0xff]  ;;  %v638_v38 = vld [vmem:[#allocation6 + $0x188] sm:$0xff] }
  0x5c   : > { %623 = vmatpush.msrb.mxu3 %v602_v62  ;;  %539 = vmatpush.msrb.mxu0 %v498_v63  ;;  %v743_v36 = vld [vmem:[#allocation8 + $0x80] sm:$0xff]  ;;  %v634_v39 = vld [vmem:[#allocation2 + $0x2] sm:$0xff]  ;;  %v635_v40 = vld [vmem:[#allocation2 + $0xa] sm:$0xff] }
  0x5d   : > { %562 = vmatpush.msrb.mxu1 %v499_v0  ;;  %586 = vmatpush.msrb.mxu2 %v497_v1  ;;  %v637_v37 = vld [vmem:[#allocation6 + $0x180] sm:$0xff]  ;;  %v1098_v1 = vld [vmem:[%s1620_s4] ss:$0 sm:$0xff] }
  0x5e   : > { %624 = vmatpush.msrb.mxu3 %v601_v2  ;;  %540 = vmatpush.msrb.mxu0 %v495_v3  ;;  %v340_v53 = vld [vmem:[#allocation9] sm:$0x7] }
  0x5f   : > { %563 = vmatpush.msrb.mxu1 %v496_v4  ;;  %981 = vmatmul.msk.f32.vlgmr.msrb.gmra.mxu0 %vm331_vm0, %v492_v5  ;;  %v444_v56 = vperm.slane %v340_v53, 0  ;;  %v445_v57 = vperm.slane %v340_v53, 1  ;;  %v446_v0 = vperm.slane %v340_v53, 2 }
  0x60   : > { %983 = vmatmul.msk.f32.vlgmr.msrb.gmra.mxu1 %vm331_vm0, %v492_v5  ;;  %985 = vmatmul.msk.f32.vlgmr.msrb.gmra.mxu2 %vm331_vm0, %v492_v5 }
  0x61   : > { %987 = vmatmul.msk.f32.vlgmr.msrb.gmra.mxu3 %vm331_vm0, %v492_v5  ;;  %721 = vmatpush.msra.mxu2 %v660_v6 }
  0x62   : > { %759 = vmatpush.msra.mxu3 %v750_v7  ;;  %675 = vmatpush.msra.mxu0 %v658_v8 }
  0x63   : > { %698 = vmatpush.msra.mxu1 %v659_v9  ;;  %722 = vmatpush.msra.mxu2 %v657_v10 }
  0x64   : > { %760 = vmatpush.msra.mxu3 %v749_v11  ;;  %676 = vmatpush.msra.mxu0 %v655_v12 }
  0x65   : > { %699 = vmatpush.msra.mxu1 %v656_v13  ;;  %723 = vmatpush.msra.mxu2 %v654_v14 }
  0x66   : > { %761 = vmatpush.msra.mxu3 %v748_v15  ;;  %677 = vmatpush.msra.mxu0 %v652_v16 }
  0x67   : > { %700 = vmatpush.msra.mxu1 %v653_v17  ;;  %724 = vmatpush.msra.mxu2 %v651_v18 }
  0x68   : > { %762 = vmatpush.msra.mxu3 %v747_v19  ;;  %678 = vmatpush.msra.mxu0 %v649_v20 }
  0x69   : > { %701 = vmatpush.msra.mxu1 %v650_v21  ;;  %982 = vmatmul.msk.f32.gmra.mxu0 %vm331_vm0, %v493_v22 }
  0x6a   : > { %984 = vmatmul.msk.f32.gmra.mxu1 %vm331_vm0, %v493_v22  ;;  %986 = vmatmul.msk.f32.gmra.mxu2 %vm331_vm0, %v493_v22 }
  0x6b   : > { %988 = vmatmul.msk.f32.gmra.mxu3 %vm331_vm0, %v493_v22  ;;  %725 = vmatpush.msra.mxu2 %v648_v23 }
  0x6c   : > { %763 = vmatpush.msra.mxu3 %v746_v24  ;;  %679 = vmatpush.msra.mxu0 %v646_v25 }
  0x6d   : > { %702 = vmatpush.msra.mxu1 %v647_v26  ;;  %726 = vmatpush.msra.mxu2 %v645_v27 }
  0x6e   : > { %764 = vmatpush.msra.mxu3 %v745_v28  ;;  %680 = vmatpush.msra.mxu0 %v643_v29 }
  0x6f   : > { %703 = vmatpush.msra.mxu1 %v644_v30  ;;  %727 = vmatpush.msra.mxu2 %v642_v31 }
  0x70   : > { %765 = vmatpush.msra.mxu3 %v744_v32  ;;  %681 = vmatpush.msra.mxu0 %v640_v33 }
  0x71   : > { %704 = vmatpush.msra.mxu1 %v641_v34  ;;  %728 = vmatpush.msra.mxu2 %v639_v35 }
  0x72   : > { %766 = vmatpush.msra.mxu3 %v743_v36  ;;  %682 = vmatpush.msra.mxu0 %v637_v37 }
  0x73   : > { %705 = vmatpush.msra.mxu1 %v638_v38  ;;  %989 = vmatmul.msk.f32.vlgmr.msra.gmra.mxu0 %vm331_vm0, %v634_v39 }
  0x74   : > { %991 = vmatmul.msk.f32.vlgmr.msra.gmra.mxu1 %vm331_vm0, %v634_v39  ;;  %993 = vmatmul.msk.f32.vlgmr.msra.gmra.mxu2 %vm331_vm0, %v634_v39 }
  0x75   : > { %995 = vmatmul.msk.f32.vlgmr.msra.gmra.mxu3 %vm331_vm0, %v634_v39 }
  0x7b   : > { %990 = vmatmul.msk.f32.gmra.mxu0 %vm331_vm0, %v635_v40 }
  0x7c   : > { %992 = vmatmul.msk.f32.gmra.mxu1 %vm331_vm0, %v635_v40  ;;  %994 = vmatmul.msk.f32.gmra.mxu2 %vm331_vm0, %v635_v40 }
  0x7d   : > { %996 = vmatmul.msk.f32.gmra.mxu3 %vm331_vm0, %v635_v40 }
  0xca   : > { %v391_v41 = vpop.f32.mrf.mxu0 }
  0xcb   : > { %v414_v42 = vpop.f32.mrf.mxu1  ;;  %v450_v58 = vadd.f32 %v444_v56, %v391_v41 }
  0xcc   : > { %v451_v59 = vadd.f32 %v445_v57, %v414_v42 }
  0xd1   : > { %v437_v43 = vpop.f32.mrf.mxu2 }
  0xd2   : > { %v481_v44 = vpop.f32.mrf.mxu3  ;;  %v394_v45 = vpop.f32.mrf.mxu0  ;;  %v452_v6 = vadd.f32 %v446_v0, %v437_v43 }
  0xd3   : > { %v417_v46 = vpop.f32.mrf.mxu1  ;;  %v490_v7 = vadd.f32 %v1098_v1, %v481_v44  ;;  %v453_v8 = vadd.f32 %v444_v56, %v394_v45 }
  0xd4   : > { %v454_v9 = vadd.f32 %v445_v57, %v417_v46 }
  0xd9   : > { %v440_v47 = vpop.f32.mrf.mxu2 }
  0xda   : > { %v484_v48 = vpop.f32.mrf.mxu3  ;;  %v455_v22 = vadd.f32 %v446_v0, %v440_v47 }
  0xdb   : > { %v491_v23 = vadd.f32 %v1098_v1, %v484_v48 }
  0xdc   : > { %v542_v49 = vpop.f32.mrf.mxu0 }
  0xdd   : > { %v565_v50 = vpop.f32.mrf.mxu1  ;;  %v594_v62 = vadd.f32 %v542_v49, %v450_v58 }
  0xde   : > { %v595_v63 = vadd.f32 %v565_v50, %v451_v59 }
  0xe3   : > { %v588_v51 = vpop.f32.mrf.mxu2 }
  0xe4   : > { %v626_v52 = vpop.f32.mrf.mxu3  ;;  %v596_v10 = vadd.f32 %v588_v51, %v452_v6 }
  0xe5   : > { %v632_v11 = vadd.f32 %v626_v52, %v490_v7 }
  0xe6   : > { %v545_v54 = vpop.f32.mrf.mxu0 }
  0xe7   : > { %v568_v55 = vpop.f32.mrf.mxu1  ;;  %v597_v12 = vadd.f32 %v545_v54, %v453_v8 }
  0xe8   : > { %v598_v13 = vadd.f32 %v568_v55, %v454_v9 }
  0xed   : > { %v591_v60 = vpop.f32.mrf.mxu2 }
  0xee   : > { %v629_v61 = vpop.f32.mrf.mxu3  ;;  %v599_v24 = vadd.f32 %v591_v60, %v455_v22 }
  0xef   : > { %v633_v25 = vadd.f32 %v629_v61, %v491_v23 }
  0xf0   : > { %v684_v2 = vpop.f32.mrf.mxu0 }
  0xf1   : > { %v707_v3 = vpop.f32.mrf.mxu1  ;;  %v736_v4 = vadd.f32 %v684_v2, %v594_v62 }
  0xf2   : > { %v737_v5 = vadd.f32 %v707_v3, %v595_v63 }
  0xf3   : > { %776 = vst [vmem:[%s1543_s9] sm:$0xff] %v736_v4 }
  0xf4   : > { %777 = vst [vmem:[%s1543_s9 + $0x8] sm:$0xff] %v737_v5 }
  0xf7   : > { %v730_v14 = vpop.f32.mrf.mxu2 }
  0xf8   : > { %v768_v15 = vpop.f32.mrf.mxu3  ;;  %v738_v16 = vadd.f32 %v730_v14, %v596_v10  ;;  %v687_v18 = vpop.f32.mrf.mxu0 }
  0xf9   : > { %v774_v17 = vadd.f32 %v768_v15, %v632_v11  ;;  %v710_v19 = vpop.f32.mrf.mxu1  ;;  %v739_v20 = vadd.f32 %v687_v18, %v597_v12 }
  0xfa   : > { %v740_v21 = vadd.f32 %v710_v19, %v598_v13  ;;  %779 = vst.msk [vmem:[%s1543_s9 + $0x10] sm:$0xff] %vm778_vm2, %v738_v16 }
  0xfb   : > { %783 = vst.msk [vmem:[%s330_s7] sm:$0xff] %vm331_vm0, %v774_v17 }
  0xfc   : > { %780 = vst [vmem:[%s1543_s9 + $0x18] sm:$0xff] %v739_v20 }
  0xfd   : > { %781 = vst [vmem:[%s1543_s9 + $0x20] sm:$0xff] %v740_v21 }
  0xff   : > { %v733_v26 = vpop.f32.mrf.mxu2 }
 0x100   : > { %v771_v27 = vpop.f32.mrf.mxu3  ;;  %v741_v28 = vadd.f32 %v733_v26, %v599_v24 }
 0x101   : > { %v775_v29 = vadd.f32 %v771_v27, %v633_v25 }
 0x102   : > { %782 = vst.msk [vmem:[%s1543_s9 + $0x28] sm:$0xff] %vm778_vm2, %v741_v28 }
 0x103   : > { %784 = vst.msk [vmem:[%s330_s7 + $0x8] sm:$0xff] %vm331_vm0, %v775_v29 }
 0x104   : > { %1246 = shalt.err (!%p1243_p10)
}
 0x105   : > { %s1335_s9 = smov 384   ;;  %s1336_s7 = smov 24  }
 0x106   : > { %1021 = dma.vmem_to_hbm [thread:$0]  (%p1459_p3), %s1562_s16, 768, %s806_s25, %s786_s30, %s1335_s9, %s1335_s9, %s1336_s7  }
 0x107   : > { %s791_s8 = scalar_lea.sflag [#allocation13], %s1489_s17  ;;  %s1261_s11 = sshra.s32 %s1567_s19, 4  ;;  %s1262_s11 = int_to_ptr.hbm [resolvable:$true] %s1261_s11 }
 0x108   : > { %s1263_s26 = scalar_lea.hbm %s1262_s11, 16  ;;  %s1267_s29 = scalar_lea.hbm %s1622_s6, 32 }
 0x109   : > { %p1264_p12 = scmp.ne.s32.totalorder %s1262_s11, %s1263_s26  ;;  %p1268_p5 = scmp.lt.s32.totalorder %s1262_s11, %s1622_s6 }
 0x10a   : > { %p1269_p7 = scmp.lt.s32.totalorder %s1267_s29, %s1263_s26 }
 0x10b   : > { %p1265_p13 = pnand %p1264_p12, %p1459_p3 }
 0x10c   : > { %p1270_p1 = por %p1269_p7, %p1268_p5 }
 0x10d   : > { %p1266_p0 = pneg %p1265_p13 }
 0x10f   : > { %p1271_p4 = pnand %p1270_p1, %p1266_p0 }
 0x111   : > { %1274 = shalt.err (!%p1271_p4)
}
 0x112   : > { %s1337_s17 = smov 128   ;;  %s1338_s16 = smov 8  }
 0x113   : > { %1022 = dma.vmem_to_hbm [thread:$0]  (%p1459_p3), %s1565_s20, 256, %s1567_s19, %s791_s8, %s1337_s17, %s1337_s17, %s1338_s16  }
 0x114 PF: > { %s837_s25 = sand.u32 1, %s1313_s21   ;;  %p1633_p8 = scmp.ge.s32.totalorder %s1325_s24, 2 }
 0x115   : > { %s838_s30 = scalar_lea.sflag [#allocation5], %s837_s25 }
 0x116   : > { %p1040_p11 = pnand %p1633_p8, %p1409_p6 }
 0x118   : > { %p1041_p9 = pneg %p1040_p11 }
 0x11a   : > { %1304 = dma.done.wait (%p1041_p9), %s838_s30, 768  }
 0x11b   : > { %1306 = vsyncadd (%p1041_p9), %s838_s30, 4294966528  ;;  %s848_s9 = scalar_lea.sflag [#allocation13], %s837_s25 }
 0x11c   : > { %1308 = dma.done.wait (%p1041_p9), %s848_s9, 256  }
 0x11d   : > { %1310 = vsyncadd (%p1041_p9), %s848_s9, 4294967040  ;;  %p25_p3 = scmp.ge.s32.totalorder %s1446_s10, 4   ;;  %s1634_s21 = smov %s1317_s22 }
 0x11e   : > { %s1635_s22 = smov %s1321_s23  ;;  %s1636_s23 = smov %s1455_s14 }
 0x11f   : > { %s1637_s24 = smov %s1446_s10  ;;  %27 = sbr.rel (!%p25_p3) target bundleno = 9 (0x9), region = 118 }
 0x124   :  { %854 = vsyncpa [#allocation4], 1 }
 0x125   :  { %856 = vsyncpa [#allocation4 + $0x1], 1 }
 0x126   :  { %857 = vsyncpa [#allocation7], 1 }
 0x127   :  { %858 = vsyncpa [#allocation10], 1 }
 0x128   :  { %859 = vsyncpa [#allocation5], 1 }
 0x129   :  { %861 = vsyncpa [#allocation5 + $0x1], 1 }
 0x12a   :  { %862 = vsyncpa [#allocation13], 1 }
 0x12b   :  { %864 = vsyncpa [#allocation13 + $0x1], 1 }

</bundles_post_ra>
